<compile_context>
chip_gen: v5e
topology: v5e:2x2
jax: 0.10.0
libtpu: 0.0.40
codegen_flags: <defaults>
</compile_context>

<pallas_src>
import functools

import jax
import jax.numpy as jnp
import numpy as np
from jax.experimental import pallas as pl
from jax.experimental.pallas import tpu as pltpu


# ----------------------------------------------------------------------------
# Fused Pallas kernel:
#   prompts    = template + ctx_row          (broadcast over classes)
#   shared_ctx = ctx @ W^T + b               (nn.Linear(ctx_dim, 768))
# ----------------------------------------------------------------------------
def _fused_kernel(n_out, tmpl_ref, ctx_row_ref, ctx_pad_ref, w_ref, b_ref,
                  prompts_ref, proj_ref):
    # Lane-dense prompt construction: the template already holds prefix/suffix
    # with zeros in the ctx slot; ctx_row holds ctx in that slot and zeros
    # elsewhere, so a single broadcast add reproduces cat([prefix, ctx, suffix]).
    prompts_ref[...] = tmpl_ref[...] + ctx_row_ref[...]

    # Projection on the MXU: bf16 inputs, f32 accumulation.  Slice to the live
    # rows first, then f32 bias add and store (768 lanes -> unmasked vst).
    acc = jnp.dot(ctx_pad_ref[...], w_ref[...],
                  preferred_element_type=jnp.float32)
    proj_ref[...] = (acc[:n_out] + b_ref[...]).astype(proj_ref.dtype)


def fused_prompts_and_proj(tmpl, ctx_row, ctx_pad, w_t, b2, *, n_out):
    """tmpl: (n_cls, seq_len*d) f32, ctx_row: (1, seq_len*d) f32,
       ctx_pad: (8, d) bf16, w_t: (d, 768) bf16, b2: (1, 768) f32."""
    n_cls, flat_len = tmpl.shape
    proj_dim = w_t.shape[1]
    vmem = pl.BlockSpec(memory_space=pltpu.MemorySpace.VMEM)
    return pl.pallas_call(
        functools.partial(_fused_kernel, n_out),
        out_shape=(jax.ShapeDtypeStruct((n_cls, flat_len), tmpl.dtype),
                   jax.ShapeDtypeStruct((n_out, proj_dim), jnp.float32)),
        in_specs=[vmem, vmem, vmem, vmem, vmem],
        out_specs=(vmem, vmem),
    )(tmpl, ctx_row, ctx_pad, w_t, b2)


@functools.partial(jax.jit, static_argnames=("n_out", "seq_len", "ctx_dim"))
def _forward_impl(tmpl, ctx_row, ctx_pad, w_t, b2, *, n_out, seq_len, ctx_dim):
    prompts_flat, shared_ctx = fused_prompts_and_proj(
        tmpl, ctx_row, ctx_pad, w_t, b2, n_out=n_out)
    n_cls = tmpl.shape[0]
    # Row-major metadata reshape back to (n_cls, seq_len, ctx_dim); fused by jit.
    return prompts_flat.reshape(n_cls, seq_len, ctx_dim), shared_ctx


# ----------------------------------------------------------------------------
# Module (parameter setup in plain JAX; forward is one fused Pallas call)
# ----------------------------------------------------------------------------
class MultiModalPromptLearnerCM:
    def __init__(self, key, n_cls=4, n_ctx=4, ctx_dim=32, seq_len=16,
                 proj_dim=768, dtype=jnp.float32):
        assert n_ctx % 2 == 0
        k = jax.random.split(key, 8)
        self.n_cls, self.n_ctx = n_cls, n_ctx
        self.ctx_dim, self.seq_len, self.proj_dim = ctx_dim, seq_len, proj_dim
        self.compound_prompts_depth = 1

        # "random initialization" branch of __init__: normal(std=0.02)
        self.ctx_0 = (0.02 * jax.random.normal(k[0], (n_ctx, ctx_dim))).astype(dtype)
        self.ctx_1 = (0.02 * jax.random.normal(k[1], (n_ctx // 2, ctx_dim))).astype(dtype)

        # proj = nn.Linear(ctx_dim, 768); PyTorch casts it to .half() -> we run
        # the matmul with bf16 inputs and f32 accumulation on the MXU.
        bound = 1.0 / np.sqrt(ctx_dim)
        self.proj_w = (bound * jax.random.uniform(
            k[2], (proj_dim, ctx_dim), minval=-1.0, maxval=1.0)).astype(dtype)
        self.proj_b = (bound * jax.random.uniform(
            k[3], (proj_dim,), minval=-1.0, maxval=1.0)).astype(dtype)
        # Hoisted glue (once, off the hot path): pre-transposed bf16 weight, 2D bias.
        self.proj_wt = self.proj_w.T.astype(jnp.bfloat16)        # (ctx_dim, 768)
        self.proj_b2 = self.proj_b.reshape(1, proj_dim)          # (1, 768) f32

        # compound_prompts_text: depth-1 == 0 parameters -> empty list.
        self.compound_prompts_text = []

        # Frozen token embeddings (stand-ins for CLIP token_embedding output).
        # TODO(synk): real CLIP tokenizer / token_embedding not reproduced here.
        emb_0 = (0.02 * jax.random.normal(k[4], (n_cls, seq_len, ctx_dim))).astype(dtype)
        emb_1 = (0.02 * jax.random.normal(k[5], (n_cls, seq_len, ctx_dim))).astype(dtype)
        self.token_prefix_0 = emb_0[:, :1, :]
        self.token_suffix_0 = emb_0[:, 1 + n_ctx:, :]
        self.token_prefix_1 = emb_1[:, :1, :]
        self.token_suffix_1 = emb_1[:, 1 + n_ctx // 2:, :]

        # Precomputed frozen prompt templates (prefix/suffix placed, ctx slot
        # zeroed), flattened to a lane-dense (n_cls, seq_len*ctx_dim) slab.
        self.tmpl_0 = self._make_template(self.token_prefix_0,
                                          self.token_suffix_0, n_ctx)
        self.tmpl_1 = self._make_template(self.token_prefix_1,
                                          self.token_suffix_1, n_ctx // 2)

        # Derived packed forms of the ctx parameters (ctx is fixed in this
        # forward-only script; in a training loop these are tiny per-step pads).
        self.ctx_row_0 = self._make_ctx_row(self.ctx_0)
        self.ctx_row_1 = self._make_ctx_row(self.ctx_1)
        self.ctx_pad_0 = self._pad_ctx(self.ctx_0)
        self.ctx_pad_1 = self._pad_ctx(self.ctx_1)

    def _make_template(self, prefix, suffix, n_tok):
        t = jnp.zeros((self.n_cls, self.seq_len, self.ctx_dim), prefix.dtype)
        t = t.at[:, :1, :].set(prefix)
        t = t.at[:, 1 + n_tok:, :].set(suffix)
        return t.reshape(self.n_cls, self.seq_len * self.ctx_dim)

    def _make_ctx_row(self, ctx):
        n_tok, d = ctx.shape
        row = jnp.zeros((1, self.seq_len * d), ctx.dtype)
        return row.at[0, d:(1 + n_tok) * d].set(ctx.reshape(-1))

    def _pad_ctx(self, ctx, rows=8):
        n_tok, d = ctx.shape
        pad = jnp.zeros((rows, d), ctx.dtype).at[:n_tok].set(ctx)
        return pad.astype(jnp.bfloat16)

    def forward(self, use_prompt):
        if use_prompt == 0:
            tmpl, ctx_row, ctx_pad, n_tok = (self.tmpl_0, self.ctx_row_0,
                                             self.ctx_pad_0, self.n_ctx)
        elif use_prompt == 1:
            tmpl, ctx_row, ctx_pad, n_tok = (self.tmpl_1, self.ctx_row_1,
                                             self.ctx_pad_1, self.n_ctx // 2)
        else:
            raise ValueError("use_prompt must be 0 or 1")

        prompts, shared_ctx = _forward_impl(
            tmpl, ctx_row, ctx_pad, self.proj_wt, self.proj_b2,
            n_out=n_tok, seq_len=self.seq_len, ctx_dim=self.ctx_dim)
        visual_deep_prompts = []
        return prompts, shared_ctx, self.compound_prompts_text, visual_deep_prompts


# ----------------------------------------------------------------------------
# Reference (plain jnp / numpy) for verification
# ----------------------------------------------------------------------------
def _reference_forward(m, use_prompt):
    if use_prompt == 0:
        ctx, prefix, suffix = m.ctx_0, m.token_prefix_0, m.token_suffix_0
    else:
        ctx, prefix, suffix = m.ctx_1, m.token_prefix_1, m.token_suffix_1
    ctx_b = jnp.broadcast_to(ctx[None], (m.n_cls,) + ctx.shape)
    prompts = jnp.concatenate([prefix, ctx_b, suffix], axis=1)
    # proj reference: numpy f32 matmul with the same bf16 input rounding as
    # the kernel (bf16 inputs, f32 accumulation), f32 bias add.
    cb = np.asarray(ctx.astype(jnp.bfloat16).astype(jnp.float32))
    wb = np.asarray(m.proj_w.T.astype(jnp.bfloat16).astype(jnp.float32))
    shared_ctx = cb @ wb + np.asarray(m.proj_b)
    return np.asarray(prompts), shared_ctx


if __name__ == "__main__":
    key = jax.random.PRNGKey(0)
    module = MultiModalPromptLearnerCM(
        key, n_cls=4, n_ctx=4, ctx_dim=32, seq_len=16, proj_dim=768)

    ok = True
    for use_prompt in (0, 1):
        prompts, shared_ctx, cpt, vdp = module.forward(use_prompt)
        jax.block_until_ready(prompts)
        jax.block_until_ready(shared_ctx)

        ref_prompts, ref_shared = _reference_forward(module, use_prompt)
        ok &= bool(np.allclose(np.asarray(prompts), ref_prompts,
                               rtol=1e-6, atol=1e-6))
        ok &= bool(np.allclose(np.asarray(shared_ctx), ref_shared,
                               rtol=1e-4, atol=1e-5))
        ok &= prompts.shape == (module.n_cls, module.seq_len, module.ctx_dim)
        expected_n = module.n_ctx if use_prompt == 0 else module.n_ctx // 2
        ok &= shared_ctx.shape == (expected_n, module.proj_dim)
        ok &= (cpt == [] and vdp == [])

    if ok:
        print("KERNEL_OK")
    else:
        raise SystemExit("mismatch vs reference")
</pallas_src>

<mosaic_0001>
module attributes {stable_mosaic.version = 11 : i64} {
  func.func @_fused_kernel(%arg0: memref<4x512xf32, #tpu.memory_space<vmem>>, %arg1: memref<1x512xf32, #tpu.memory_space<vmem>>, %arg2: memref<8x32xbf16, #tpu.memory_space<vmem>>, %arg3: memref<32x768xbf16, #tpu.memory_space<vmem>>, %arg4: memref<1x768xf32, #tpu.memory_space<vmem>>, %arg5: memref<4x512xf32, #tpu.memory_space<vmem>>, %arg6: memref<4x768xf32, #tpu.memory_space<vmem>>) attributes {dimension_semantics = [], scalar_prefetch = 0 : i64, scratch_operands = 0 : i64, tpu.core_type = #tpu.core_type<tc>} {
    %c0 = arith.constant 0 : index
    %c0_0 = arith.constant 0 : index
    %0 = vector.load %arg0[%c0, %c0_0] : memref<4x512xf32, #tpu.memory_space<vmem>>, vector<4x512xf32>
    %c0_1 = arith.constant 0 : index
    %c0_2 = arith.constant 0 : index
    %1 = vector.load %arg1[%c0_1, %c0_2] : memref<1x512xf32, #tpu.memory_space<vmem>>, vector<1x512xf32>
    %2 = vector.broadcast %1 : vector<1x512xf32> to vector<4x512xf32>
    %3 = arith.addf %0, %2 : vector<4x512xf32>
    %c0_3 = arith.constant 0 : index
    %c0_4 = arith.constant 0 : index
    %4 = vector.load %arg5[%c0_3, %c0_4] : memref<4x512xf32, #tpu.memory_space<vmem>>, vector<4x512xf32>
    tpu.vector_store %arg5[%c0_3, %c0_4], %3 {strides = array<i32>} : memref<4x512xf32, #tpu.memory_space<vmem>>, vector<4x512xf32>,
    %c0_5 = arith.constant 0 : index
    %c0_6 = arith.constant 0 : index
    %5 = vector.load %arg2[%c0_5, %c0_6] : memref<8x32xbf16, #tpu.memory_space<vmem>>, vector<8x32xbf16>
    %c0_7 = arith.constant 0 : index
    %c0_8 = arith.constant 0 : index
    %6 = vector.load %arg3[%c0_7, %c0_8] : memref<32x768xbf16, #tpu.memory_space<vmem>>, vector<32x768xbf16>
    %cst = arith.constant dense<0.000000e+00> : vector<8x768xf32>
    %7 = tpu.matmul %5, %6, %cst {dimension_numbers = #tpu.dot_dimension_numbers<[1], [0], [0], [1], [0, 0, 1, 1], [], []>} : vector<8x32xbf16>, vector<32x768xbf16>, vector<8x768xf32> -> vector<8x768xf32>
    %8 = vector.extract_strided_slice %7 {offsets = [0, 0], sizes = [4, 768], strides = [1, 1]} : vector<8x768xf32> to vector<4x768xf32>
    %c0_9 = arith.constant 0 : index
    %c0_10 = arith.constant 0 : index
    %9 = vector.load %arg4[%c0_9, %c0_10] : memref<1x768xf32, #tpu.memory_space<vmem>>, vector<1x768xf32>
    %10 = vector.broadcast %9 : vector<1x768xf32> to vector<4x768xf32>
    %11 = arith.addf %8, %10 : vector<4x768xf32>
    %c0_11 = arith.constant 0 : index
    %c0_12 = arith.constant 0 : index
    %12 = vector.load %arg6[%c0_11, %c0_12] : memref<4x768xf32, #tpu.memory_space<vmem>>, vector<4x768xf32>
    tpu.vector_store %arg6[%c0_11, %c0_12], %11 {strides = array<i32>} : memref<4x768xf32, #tpu.memory_space<vmem>>, vector<4x768xf32>,
    return
  }
}

</mosaic_0001>

<bundles_post_ra>
// kernel: _forward_impl.1
= control target key start
LH: loop header
LB: loop body
LE: loop exit
PB: predicated region body
PF: predicated region fallthrough
CT: control target
= control target key end

     0   :  { %12 = vsyncpa [#allocation3], 0  ;;  %s633_s0 = inlined_call_operand.hbm [shape: f32[4,512], index: 0, kind: input, shape index: {}]   ;;  %s634_s1 = inlined_call_operand.hbm [shape: f32[1,512], index: 1, kind: input, shape index: {}]   ;;  %s635_s2 = inlined_call_operand.hbm [shape: bf16[8,32], index: 2, kind: input, shape index: {}]   ;;  %s636_s3 = inlined_call_operand.hbm [shape: bf16[32,768], index: 3, kind: input, shape index: {}]   ;;  %s637_s4 = inlined_call_operand.hbm [shape: f32[1,768], index: 4, kind: input, shape index: {}]   ;;  %s638_s5 = inlined_call_operand.vmem [shape: f32[4,512], index: 5, kind: output, shape index: {0}]   ;;  %s639_s6 = inlined_call_operand.hbm [shape: f32[4,768], index: 6, kind: output, shape index: {1}]  }
   0x1   :  { %13 = vsyncpa [#allocation6], 0 }
   0x2   :  { %14 = vsyncpa [#allocation9], 0  ;;  %s32_s23 = sshll.u32 %s634_s1, 4  ;;  %s33_s23 = int_to_ptr.hbm [resolvable:$true] %s32_s23 }
   0x3   :  { %15 = vsyncpa [#allocation4], 0  ;;  %s555_s24 = smov [#allocation5]   ;;  %s53_s28 = sshll.u32 %s636_s3, 4  ;;  %s54_s28 = int_to_ptr.hbm [resolvable:$true] %s53_s28 }
   0x4   :  { %s34_s25 = sshll.u32 %s555_s24, 4  ;;  %s556_s29 = smov [#allocation8]   ;;  %s35_s25 = int_to_ptr.vmem [resolvable:$true] %s34_s25 }
   0x5   :  { %37 = dma.hbm_to_vmem [thread:$0]  %s33_s23, 64, %s35_s25, [#allocation6]  }
   0x6   :  { %s55_s30 = sshll.u32 %s556_s29, 4  ;;  %s557_s7 = smov 384   ;;  %s56_s30 = int_to_ptr.vmem [resolvable:$true] %s55_s30 }
   0x7   :  { %s558_s8 = smov 24   ;;  %s21_s1 = sshll.u32 %s633_s0, 4  ;;  %s22_s1 = int_to_ptr.hbm [resolvable:$true] %s21_s1 }
   0x8   :  { %61 = dma.hbm_to_vmem [thread:$0]  %s54_s28, 1536, %s56_s30, [#allocation9], %s557_s7, %s557_s7, %s558_s8  }
   0x9   :  { %s559_s11 = smov [#allocation2]   ;;  %s43_s3 = sshll.u32 %s635_s2, 4  ;;  %s44_s3 = int_to_ptr.hbm [resolvable:$true] %s43_s3 }
   0xa   :  { %s23_s12 = sshll.u32 %s559_s11, 4  ;;  %s560_s15 = smov [#allocation7]   ;;  %s24_s12 = int_to_ptr.vmem [resolvable:$true] %s23_s12 }
   0xb   :  { %26 = dma.hbm_to_vmem [thread:$0]  %s22_s1, 256, %s24_s12, [#allocation3]  }
   0xc   :  { %s45_s16 = sshll.u32 %s560_s15, 4  ;;  %s67_s19 = sshll.u32 %s637_s4, 4  ;;  %s46_s16 = int_to_ptr.vmem [resolvable:$true] %s45_s16  ;;  %s68_s19 = int_to_ptr.hbm [resolvable:$true] %s67_s19 }
   0xd   :  { %48 = dma.hbm_to_vmem [thread:$0]  %s44_s3, 64, %s46_s16, [#allocation6]  }
   0xe   :  { %s561_s0 = smov [#allocation10]  }
   0xf   :  { %s69_s20 = sshll.u32 %s561_s0, 4  ;;  %s70_s20 = int_to_ptr.vmem [resolvable:$true] %s69_s20 }
  0x10   :  { %72 = dma.hbm_to_vmem [thread:$0]  %s68_s19, 96, %s70_s20, [#allocation9]  }
  0x11   :  { %547 = dma.done.wait [#allocation3], 256  }
  0x12   :  { %548 = vsyncadd [#allocation3], 4294967040 }
  0x13   :  { %549 = dma.done.wait [#allocation6], 128  }
  0x14   :  { %550 = vsyncadd [#allocation6], 4294967168 }
  0x15   :  { %551 = dma.done.wait [#allocation9], 1632  }
  0x16   :  { %552 = vsyncadd [#allocation9], 4294965664  ;;  %vm186_vm0 = vcmask 261120   ;;  %v355_v0 = vld [vmem:[#allocation8 + $0x30] sm:$0xf]  ;;  %v94_v42 = vld [vmem:[#allocation2] sm:$0xff] }
  0x17   :  { %v392_v1 = vld [vmem:[#allocation8 + $0x44] sm:$0xf0]  ;;  %v389_v2 = vld [vmem:[#allocation8 + $0x34] sm:$0xf]  ;;  %v357_v4 = vld [vmem:[#allocation8 + $0x48] sm:$0xf0] }
  0x18   :  { %v356_v3 = vor.u32 %v392_v1, %v355_v0  ;;  %v363_v5 = vld [vmem:[#allocation8 + $0x38] sm:$0xf]  ;;  %v393_v6 = vld [vmem:[#allocation8 + $0x4c] sm:$0xf0]  ;;  %v360_v7 = vor.u32 %v389_v2, %v357_v4  ;;  %v390_v9 = vld [vmem:[#allocation8 + $0x3c] sm:$0xf] }
  0x19   :  { %v364_v8 = vor.u32 %v393_v6, %v363_v5  ;;  %v365_v10 = vld [vmem:[#allocation8 + $0x50] sm:$0xf0]  ;;  %v331_v11 = vld [vmem:[#allocation8] sm:$0xf]  ;;  %v386_v13 = vld [vmem:[#allocation8 + $0x14] sm:$0xf0] }
  0x1a   :  { %196 = vmatpush.bf16.msra.mxu0 %v356_v3  ;;  %v368_v12 = vor.u32 %v390_v9, %v365_v10  ;;  %v383_v14 = vld [vmem:[#allocation8 + $0x4] sm:$0xf]  ;;  %v333_v15 = vld [vmem:[#allocation8 + $0x18] sm:$0xf0]  ;;  %209 = vmatpush.bf16.msra.mxu1 %v360_v7  ;;  %v332_v16 = vor.u32 %v386_v13, %v331_v11  ;;  %v339_v18 = vld [vmem:[#allocation8 + $0x8] sm:$0xf] }
  0x1b   :  { %222 = vmatpush.bf16.msra.mxu2 %v364_v8  ;;  %v336_v17 = vor.u32 %v383_v14, %v333_v15  ;;  %v387_v19 = vld [vmem:[#allocation8 + $0x1c] sm:$0xf0]  ;;  %v384_v20 = vld [vmem:[#allocation8 + $0xc] sm:$0xf]  ;;  %v341_v22 = vld [vmem:[#allocation8 + $0x20] sm:$0xf0] }
  0x1c   :  { %235 = vmatpush.bf16.msra.mxu3 %v368_v12  ;;  %v340_v21 = vor.u32 %v387_v19, %v339_v18  ;;  %v113_v23 = vld [vmem:[#allocation7] sm:$0xf]  ;;  %v371_v24 = vld [vmem:[#allocation8 + $0x40] sm:$0xf]  ;;  %v344_v25 = vor.u32 %v384_v20, %v341_v22  ;;  %v394_v26 = vld [vmem:[#allocation8 + $0x54] sm:$0xf0] }
  0x1d   :  { %v391_v27 = vld [vmem:[#allocation8 + $0x44] sm:$0xf]  ;;  %v373_v28 = vld [vmem:[#allocation8 + $0x58] sm:$0xf0]  ;;  %v372_v29 = vor.u32 %v394_v26, %v371_v24  ;;  %v347_v31 = vld [vmem:[#allocation8 + $0x10] sm:$0xf] }
  0x1e   :  { %197 = vmatpush.bf16.msra.mxu0 %v332_v16  ;;  %v376_v30 = vor.u32 %v391_v27, %v373_v28  ;;  %v388_v32 = vld [vmem:[#allocation8 + $0x24] sm:$0xf0]  ;;  %v385_v33 = vld [vmem:[#allocation8 + $0x14] sm:$0xf]  ;;  %210 = vmatpush.bf16.msra.mxu1 %v336_v17  ;;  %v349_v34 = vld [vmem:[#allocation8 + $0x28] sm:$0xf0] }
  0x1f   :  { %223 = vmatpush.bf16.msra.mxu2 %v340_v21  ;;  %v348_v35 = vor.u32 %v388_v32, %v347_v31  ;;  %v352_v36 = vor.u32 %v385_v33, %v349_v34  ;;  %v96_v37 = vld [vmem:[#allocation5] sm:$0xf]  ;;  %v95_v43 = vld [vmem:[#allocation2 + $0x8] sm:$0xff]  ;;  %vm104_vm1 = vcmask 1043456   ;;  %v268_v50 = vld [vmem:[#allocation10] sm:$0x3f] }
  0x20   :  { %236 = vmatpush.bf16.msra.mxu3 %v344_v25  ;;  %v98_v38 = vperm.slane %v96_v37, 0  ;;  %v99_v39 = vperm.slane %v96_v37, 1  ;;  %v100_v40 = vperm.slane %v96_v37, 2  ;;  %v101_v41 = vperm.slane %v96_v37, 3  ;;  %s315_s26 = sshll.u32 %s639_s6, 4  ;;  %s316_s26 = int_to_ptr.hbm [resolvable:$true] %s315_s26 }
  0x21   :  { %377 = vmatmul.msk.bf16.vlgmr.msra.gmra.mxu0 %vm186_vm0, %v113_v23  ;;  %378 = vmatmul.msk.bf16.vlgmr.msra.gmra.mxu1 %vm186_vm0, %v113_v23  ;;  %v271_v51 = vperm.slane %v268_v50, 1  ;;  %v270_v53 = vperm.slane %v268_v50, 0  ;;  %v272_v58 = vperm.slane %v268_v50, 2  ;;  %v273_v59 = vperm.slane %v268_v50, 3 }
  0x22   :  { %248 = vmatpush.bf16.msrb.mxu0 %v372_v29  ;;  %261 = vmatpush.bf16.msrb.mxu1 %v376_v30  ;;  %v102_v44 = vrot.slane %v99_v39, 4  ;;  %v103_v45 = vrot.slane %v101_v41, 4  ;;  %v275_v5 = vperm.slane %v268_v50, 5  ;;  %v274_v9 = vperm.slane %v268_v50, 4 }
  0x23   :  { %379 = vmatmul.msk.bf16.vlgmr.msra.gmra.mxu2 %vm186_vm0, %v113_v23  ;;  %380 = vmatmul.msk.bf16.vlgmr.msra.gmra.mxu3 %vm186_vm0, %v113_v23 }
  0x24   :  { %v105_v46 = vsel %vm104_vm1, %v98_v38, %v102_v44  ;;  %v106_v47 = vsel %vm104_vm1, %v100_v40, %v103_v45 }
  0x25   :  { %v109_v48 = vadd.f32 %v105_v46, %v94_v42  ;;  %v110_v49 = vadd.f32 %v106_v47, %v95_v43 }
  0x26   :  { %249 = vmatpush.bf16.msrb.mxu0 %v348_v35  ;;  %262 = vmatpush.bf16.msrb.mxu1 %v352_v36 }
  0x27   :  { %111 = vst [vmem:[%s638_s5] sm:$0xff] %v109_v48 }
  0x28   :  { %112 = vst [vmem:[%s638_s5 + $0x8] sm:$0xff] %v110_v49  ;;  %s562_s5 = smov [#allocation11]  }
  0x29   :  { %s313_s23 = sshll.u32 %s562_s5, 4  ;;  %s314_s23 = int_to_ptr.vmem [resolvable:$true] %s313_s23 }
  0x31   :  { %381 = vmatmul.msk.bf16.vlgmr.msrb.gmra.mxu0 %vm186_vm0, %v113_v23  ;;  %382 = vmatmul.msk.bf16.vlgmr.msrb.gmra.mxu1 %vm186_vm0, %v113_v23 }
  0x9e   :  { %v199_v52 = vpop.f32.mrf.mxu0  ;;  %v212_v54 = vpop.f32.mrf.mxu1 }
  0x9f   :  { %v283_v55 = vadd.f32 %v271_v51, %v212_v54  ;;  %v282_v56 = vadd.f32 %v270_v53, %v199_v52 }
  0xa1   :  { %v294_v57 = vrot.slane %v283_v55, 4 }
  0xa3   :  { %v297_v60 = vsel %vm104_vm1, %v282_v56, %v294_v57 }
  0xa4   :  { %303 = vst [vmem:[#allocation11] sm:$0xff] %v297_v60 }
  0xa6   :  { %v225_v61 = vpop.f32.mrf.mxu2  ;;  %v201_v62 = vpop.f32.mrf.mxu0 }
  0xa7   :  { %v238_v63 = vpop.f32.mrf.mxu3  ;;  %v214_v0 = vpop.f32.mrf.mxu1  ;;  %v284_v1 = vadd.f32 %v272_v58, %v225_v61 }
  0xa8   :  { %v285_v2 = vadd.f32 %v273_v59, %v238_v63 }
  0xaa   :  { %v295_v3 = vrot.slane %v285_v2, 4 }
  0xac   :  { %v298_v4 = vsel %vm104_vm1, %v284_v1, %v295_v3 }
  0xad   :  { %304 = vst [vmem:[#allocation11 + $0x8] sm:$0xff] %v298_v4 }
  0xae   :  { %v227_v6 = vpop.f32.mrf.mxu2  ;;  %v251_v8 = vpop.f32.mrf.mxu0 }
  0xaf   :  { %v240_v7 = vpop.f32.mrf.mxu3  ;;  %v264_v10 = vpop.f32.mrf.mxu1  ;;  %v286_v12 = vadd.f32 %v274_v9, %v251_v8 }
  0xb0   :  { %v287_v11 = vadd.f32 %v275_v5, %v264_v10 }
  0xb2   :  { %v296_v13 = vrot.slane %v287_v11, 4 }
  0xb4   :  { %v299_v14 = vsel %vm104_vm1, %v286_v12, %v296_v13 }
  0xb5   :  { %305 = vst [vmem:[#allocation11 + $0x10] sm:$0xff] %v299_v14 }
  0xb6   :  { %v253_v15 = vpop.f32.mrf.mxu0  ;;  %318 = dma.vmem_to_hbm [thread:$0]  %s314_s23, 384, %s316_s26, [#allocation4]  }
  0xb7   :  { %v266_v16 = vpop.f32.mrf.mxu1 }
  0xb8   :  { %553 = dma.done.wait [#allocation4], 384  }
  0xb9   :  { %554 = vsyncadd [#allocation4], 4294966912 }
  0xba   :  { %325 = vsyncpa [#allocation3], 1 }
  0xbb   :  { %326 = vsyncpa [#allocation6], 1 }
  0xbc   :  { %327 = vsyncpa [#allocation9], 1 }
  0xbd   :  { %328 = vsyncpa [#allocation4], 1 }

</bundles_post_ra>
